<compile_context>
chip_gen: v7x
topology: tpu7x:2x2x1
jax: 0.10.0
libtpu: 0.0.40
codegen_flags: <defaults>
</compile_context>

<pallas_src>
import jax
import jax.numpy as jnp
from jax.experimental import pallas as pl
from jax.experimental.pallas import tpu as pltpu

OUTPUT_DIM = 28 * 28  # 784
LANE = 128
SUBLANE = 8


def _round_up(x, m):
    return ((x + m - 1) // m) * m


def _decoder_kernel(x_ref,
                    w1_ref, b1_ref,   # latent -> hidden
                    w2_ref, b2_ref,   # hidden -> hidden
                    w3_ref, b3_ref,   # hidden -> output (padded to 7*128)
                    out_ref):
    # Layer 1: cast x to the weight dtype so bf16 weights take the MXU fast path.
    x = x_ref[...].astype(w1_ref.dtype)
    h = jnp.dot(x, w1_ref[...], preferred_element_type=jnp.float32) + b1_ref[...]
    h = jnp.maximum(h, 0.0)                                            # ReLU

    # Layer 2 (f32 accumulation; inter-layer activation cast to weight dtype).
    h = jnp.dot(h.astype(w2_ref.dtype), w2_ref[...],
                preferred_element_type=jnp.float32) + b2_ref[...]
    h = jnp.maximum(h, 0.0)                                            # ReLU

    # Layer 3 (no activation).
    y = jnp.dot(h.astype(w3_ref.dtype), w3_ref[...],
                preferred_element_type=jnp.float32) + b3_ref[...]
    out_ref[...] = y.astype(out_ref.dtype)


def _choose_batch_tile(B, block_batch):
    tb = min(block_batch, _round_up(B, SUBLANE))
    # v7x megacore: ("parallel",) only helps if the grid has >= 2 steps.
    if B > SUBLANE and pl.cdiv(B, tb) < 2:
        tb = _round_up(pl.cdiv(B, 2), SUBLANE)
    # v5e: keep big tiles 128-aligned (clean MXU passes / unmasked stores).
    if tb >= LANE:
        tb = min(_round_up(tb, LANE), block_batch)
    return tb


def _padded_bytes(shape, dtype):
    itemsize = jnp.dtype(dtype).itemsize
    sub = max(SUBLANE, 32 // itemsize)          # bf16 packs 16 rows / vreg
    return _round_up(shape[0], sub) * _round_up(shape[1], LANE) * itemsize


def _vmem_budget(tb, L, O_pad, io_dtype, weight_bytes):
    io_bytes = jnp.dtype(io_dtype).itemsize
    x_tile = tb * _round_up(L, LANE) * io_bytes
    o_tile = tb * O_pad * io_bytes
    est = 2 * (x_tile + o_tile) + weight_bytes + (4 << 20)   # dbl-buffered I/O
    return int(max(16 << 20, min(48 << 20, est)))            # cap for v7x (64 MiB/TC)


def decoder_forward(x, params, *, block_batch=1024, io_dtype=jnp.bfloat16,
                    return_padded=False):
    """Decoder forward.  x: (B, latent_dim) -> (B, 784).

    io_dtype (default bf16): dtype used for streaming x / weights / output.
    The kernel is HBM-bound on the (B, 784) output stream, so bf16 halves the
    traffic.  Biases and MXU accumulation stay f32.  Pass io_dtype=jnp.float32
    for a full-precision path.
    """
    B, L = x.shape
    H = params["w1"].shape[1]
    O = params["w3"].shape[1]
    O_pad = _round_up(O, LANE)          # 784 -> 896: lane-dense output stores

    x = x.astype(io_dtype)
    w1 = params["w1"].astype(io_dtype)
    w2 = params["w2"].astype(io_dtype)
    w3 = params["w3"].astype(io_dtype)
    b1 = params["b1"].astype(jnp.float32)
    b2 = params["b2"].astype(jnp.float32)
    b3 = params["b3"].astype(jnp.float32)
    if O_pad != O:
        w3 = jnp.pad(w3, ((0, 0), (0, O_pad - O)))
        b3 = jnp.pad(b3, ((0, 0), (0, O_pad - O)))

    tb = _choose_batch_tile(B, block_batch)
    grid = (pl.cdiv(B, tb),)

    weight_list = (w1, b1, w2, b2, w3, b3)
    weight_bytes = sum(_padded_bytes(w.shape, w.dtype) for w in weight_list)
    vmem_limit = _vmem_budget(tb, L, O_pad, io_dtype, weight_bytes)

    flops = 2 * B * (L * H + H * H + H * O_pad)
    bytes_accessed = B * (L + O_pad) * jnp.dtype(io_dtype).itemsize + weight_bytes

    def call(single_buffer_weights):
        if single_buffer_weights:
            # Constant block index -> VMEM-resident; single-buffered (no refetch
            # needed, halves resident-weight VMEM).
            def resident(a):
                return pl.BlockSpec(a.shape, lambda i: (0, 0),
                                    pipeline_mode=pl.Buffered(1))
        else:
            def resident(a):
                return pl.BlockSpec(a.shape, lambda i: (0, 0))
        return pl.pallas_call(
            _decoder_kernel,
            out_shape=jax.ShapeDtypeStruct((B, O_pad), io_dtype),
            grid=grid,
            in_specs=[
                pl.BlockSpec((tb, L), lambda i: (i, 0)),
                resident(w1), resident(b1),
                resident(w2), resident(b2),
                resident(w3), resident(b3),
            ],
            out_specs=pl.BlockSpec((tb, O_pad), lambda i: (i, 0)),
            compiler_params=pltpu.CompilerParams(
                dimension_semantics=("parallel",),
                vmem_limit_bytes=vmem_limit,
            ),
            cost_estimate=pl.CostEstimate(
                flops=flops, transcendentals=0, bytes_accessed=bytes_accessed),
        )(x, w1, b1, w2, b2, w3, b3)

    try:
        out = call(single_buffer_weights=True)
    except Exception:
        # Older jax without BlockSpec(pipeline_mode=...): default double-buffering.
        out = call(single_buffer_weights=False)

    if return_padded or O_pad == O:
        return out
    return out[:, :O]


def init_params(key, latent_dim, hidden, output_dim):
    """PyTorch nn.Linear default init: U[-1/sqrt(fan_in), 1/sqrt(fan_in)].

    Weights stored (in_features, out_features); biases (1, out_features).
    """
    def linear(k, fan_in, fan_out):
        kw, kb = jax.random.split(k)
        bound = 1.0 / jnp.sqrt(float(fan_in))
        w = jax.random.uniform(kw, (fan_in, fan_out), jnp.float32, -bound, bound)
        b = jax.random.uniform(kb, (1, fan_out), jnp.float32, -bound, bound)
        return w, b

    k1, k2, k3 = jax.random.split(key, 3)
    w1, b1 = linear(k1, latent_dim, hidden)
    w2, b2 = linear(k2, hidden, hidden)
    w3, b3 = linear(k3, hidden, output_dim)
    return {"w1": w1, "b1": b1, "w2": w2, "b2": b2, "w3": w3, "b3": b3}


def _reference_forward(x, p):
    h = jnp.maximum(x @ p["w1"] + p["b1"], 0.0)
    h = jnp.maximum(h @ p["w2"] + p["b2"], 0.0)
    return h @ p["w3"] + p["b3"]


if __name__ == "__main__":
    key = jax.random.PRNGKey(0)
    kx, kp = jax.random.split(key)

    batch = 8
    latent_dim = 20          # Decoder default latent_dim
    hidden = 64              # hparams['encoder_n_hidden'] (small test size)

    x = jax.random.normal(kx, (batch, latent_dim), jnp.float32)
    params = init_params(kp, latent_dim, hidden, OUTPUT_DIM)

    ref = _reference_forward(x, params)

    # ---- f32 path.  Both kernel and reference use the TPU MXU's default
    # precision (bf16-rounded inputs, f32 accumulation), so tolerance is set
    # above that rounding noise rather than at exact-f32 level.
    out = jax.block_until_ready(decoder_forward(x, params, io_dtype=jnp.float32))
    assert out.shape == (batch, OUTPUT_DIM)
    assert jnp.allclose(out, ref, atol=2e-3, rtol=2e-3), "f32 mismatch vs reference"

    # ---- default bf16 streaming path (HBM-bound -> ~2x); f32 accumulation,
    # bf16 inter-layer activations, hence the looser tolerance.
    out_bf = jax.block_until_ready(decoder_forward(x, params))
    assert out_bf.shape == (batch, OUTPUT_DIM) and out_bf.dtype == jnp.bfloat16
    assert jnp.allclose(out_bf.astype(jnp.float32), ref, atol=5e-2, rtol=5e-2), \
        "bf16 mismatch vs reference"

    print("KERNEL_OK")
</pallas_src>

<mosaic_0001>
module attributes {stable_mosaic.version = 11 : i64} {
  func.func @_decoder_kernel(%arg0: i32, %arg1: memref<8x20xf32, #tpu.memory_space<vmem>>, %arg2: memref<20x64xf32, #tpu.memory_space<vmem>>, %arg3: memref<1x64xf32, #tpu.memory_space<vmem>>, %arg4: memref<64x64xf32, #tpu.memory_space<vmem>>, %arg5: memref<1x64xf32, #tpu.memory_space<vmem>>, %arg6: memref<64x896xf32, #tpu.memory_space<vmem>>, %arg7: memref<1x896xf32, #tpu.memory_space<vmem>>, %arg8: memref<8x896xf32, #tpu.memory_space<vmem>>) attributes {dimension_semantics = [#tpu.dimension_semantics<parallel>], iteration_bounds = array<i64: 1>, scalar_prefetch = 0 : i64, scratch_operands = 0 : i64, tpu.core_type = #tpu.core_type<tc>, window_params = [{transform_indices = @transform_0, window_bounds = array<i64: 8, 20>}, {pipeline_mode = #tpu.pipeline_mode<synchronous>, transform_indices = @transform_1, window_bounds = array<i64: 20, 64>}, {pipeline_mode = #tpu.pipeline_mode<synchronous>, transform_indices = @transform_2, window_bounds = array<i64: 1, 64>}, {pipeline_mode = #tpu.pipeline_mode<synchronous>, transform_indices = @transform_3, window_bounds = array<i64: 64, 64>}, {pipeline_mode = #tpu.pipeline_mode<synchronous>, transform_indices = @transform_4, window_bounds = array<i64: 1, 64>}, {pipeline_mode = #tpu.pipeline_mode<synchronous>, transform_indices = @transform_5, window_bounds = array<i64: 64, 896>}, {pipeline_mode = #tpu.pipeline_mode<synchronous>, transform_indices = @transform_6, window_bounds = array<i64: 1, 896>}, {transform_indices = @transform_7, window_bounds = array<i64: 8, 896>}]} {
    %c0 = arith.constant 0 : index
    %c0_0 = arith.constant 0 : index
    %0 = vector.load %arg1[%c0, %c0_0] : memref<8x20xf32, #tpu.memory_space<vmem>>, vector<8x20xf32>
    %c0_1 = arith.constant 0 : index
    %c0_2 = arith.constant 0 : index
    %1 = vector.load %arg2[%c0_1, %c0_2] : memref<20x64xf32, #tpu.memory_space<vmem>>, vector<20x64xf32>
    %cst = arith.constant dense<0.000000e+00> : vector<8x64xf32>
    %2 = tpu.matmul %0, %1, %cst {dimension_numbers = #tpu.dot_dimension_numbers<[1], [0], [0], [1], [0, 0, 1, 1], [], []>} : vector<8x20xf32>, vector<20x64xf32>, vector<8x64xf32> -> vector<8x64xf32>
    %c0_3 = arith.constant 0 : index
    %c0_4 = arith.constant 0 : index
    %3 = vector.load %arg3[%c0_3, %c0_4] : memref<1x64xf32, #tpu.memory_space<vmem>>, vector<1x64xf32>
    %4 = vector.broadcast %3 : vector<1x64xf32> to vector<8x64xf32>
    %5 = arith.addf %2, %4 : vector<8x64xf32>
    %cst_5 = arith.constant 0.000000e+00 : f32
    %6 = vector.broadcast %cst_5 : f32 to vector<8x64xf32>
    %7 = arith.maximumf %5, %6 : vector<8x64xf32>
    %c0_6 = arith.constant 0 : index
    %c0_7 = arith.constant 0 : index
    %8 = vector.load %arg4[%c0_6, %c0_7] : memref<64x64xf32, #tpu.memory_space<vmem>>, vector<64x64xf32>
    %cst_8 = arith.constant dense<0.000000e+00> : vector<8x64xf32>
    %9 = tpu.matmul %7, %8, %cst_8 {dimension_numbers = #tpu.dot_dimension_numbers<[1], [0], [0], [1], [0, 0, 1, 1], [], []>} : vector<8x64xf32>, vector<64x64xf32>, vector<8x64xf32> -> vector<8x64xf32>
    %c0_9 = arith.constant 0 : index
    %c0_10 = arith.constant 0 : index
    %10 = vector.load %arg5[%c0_9, %c0_10] : memref<1x64xf32, #tpu.memory_space<vmem>>, vector<1x64xf32>
    %11 = vector.broadcast %10 : vector<1x64xf32> to vector<8x64xf32>
    %12 = arith.addf %9, %11 : vector<8x64xf32>
    %cst_11 = arith.constant 0.000000e+00 : f32
    %13 = vector.broadcast %cst_11 : f32 to vector<8x64xf32>
    %14 = arith.maximumf %12, %13 : vector<8x64xf32>
    %c0_12 = arith.constant 0 : index
    %c0_13 = arith.constant 0 : index
    %15 = vector.load %arg6[%c0_12, %c0_13] : memref<64x896xf32, #tpu.memory_space<vmem>>, vector<64x896xf32>
    %cst_14 = arith.constant dense<0.000000e+00> : vector<8x896xf32>
    %16 = tpu.matmul %14, %15, %cst_14 {dimension_numbers = #tpu.dot_dimension_numbers<[1], [0], [0], [1], [0, 0, 1, 1], [], []>} : vector<8x64xf32>, vector<64x896xf32>, vector<8x896xf32> -> vector<8x896xf32>
    %c0_15 = arith.constant 0 : index
    %c0_16 = arith.constant 0 : index
    %17 = vector.load %arg7[%c0_15, %c0_16] : memref<1x896xf32, #tpu.memory_space<vmem>>, vector<1x896xf32>
    %18 = vector.broadcast %17 : vector<1x896xf32> to vector<8x896xf32>
    %19 = arith.addf %16, %18 : vector<8x896xf32>
    %c0_17 = arith.constant 0 : index
    %c0_18 = arith.constant 0 : index
    %20 = vector.load %arg8[%c0_17, %c0_18] : memref<8x896xf32, #tpu.memory_space<vmem>>, vector<8x896xf32>
    tpu.vector_store %arg8[%c0_17, %c0_18], %19 {strides = array<i32>} : memref<8x896xf32, #tpu.memory_space<vmem>>, vector<8x896xf32>,
    return
  }
  func.func @transform_0(%arg0: i32) -> (i32, i32) {
    %c0_i32 = arith.constant 0 : i32
    %c0_i32_0 = arith.constant 0 : i32
    return %arg0, %c0_i32 : i32, i32
  }
  func.func @transform_1(%arg0: i32) -> (i32, i32) {
    %c0_i32 = arith.constant 0 : i32
    %c0_i32_0 = arith.constant 0 : i32
    %c0_i32_1 = arith.constant 0 : i32
    return %c0_i32, %c0_i32_0 : i32, i32
  }
  func.func @transform_2(%arg0: i32) -> (i32, i32) {
    %c0_i32 = arith.constant 0 : i32
    %c0_i32_0 = arith.constant 0 : i32
    %c0_i32_1 = arith.constant 0 : i32
    return %c0_i32, %c0_i32_0 : i32, i32
  }
  func.func @transform_3(%arg0: i32) -> (i32, i32) {
    %c0_i32 = arith.constant 0 : i32
    %c0_i32_0 = arith.constant 0 : i32
    %c0_i32_1 = arith.constant 0 : i32
    return %c0_i32, %c0_i32_0 : i32, i32
  }
  func.func @transform_4(%arg0: i32) -> (i32, i32) {
    %c0_i32 = arith.constant 0 : i32
    %c0_i32_0 = arith.constant 0 : i32
    %c0_i32_1 = arith.constant 0 : i32
    return %c0_i32, %c0_i32_0 : i32, i32
  }
  func.func @transform_5(%arg0: i32) -> (i32, i32) {
    %c0_i32 = arith.constant 0 : i32
    %c0_i32_0 = arith.constant 0 : i32
    %c0_i32_1 = arith.constant 0 : i32
    return %c0_i32, %c0_i32_0 : i32, i32
  }
  func.func @transform_6(%arg0: i32) -> (i32, i32) {
    %c0_i32 = arith.constant 0 : i32
    %c0_i32_0 = arith.constant 0 : i32
    %c0_i32_1 = arith.constant 0 : i32
    return %c0_i32, %c0_i32_0 : i32, i32
  }
  func.func @transform_7(%arg0: i32) -> (i32, i32) {
    %c0_i32 = arith.constant 0 : i32
    %c0_i32_0 = arith.constant 0 : i32
    return %arg0, %c0_i32 : i32, i32
  }
}

module attributes {stable_mosaic.version = 11 : i64} {
  func.func @_decoder_kernel(%arg0: i32, %arg1: memref<8x20xf32, #tpu.memory_space<vmem>>, %arg2: memref<20x64xf32, #tpu.memory_space<vmem>>, %arg3: memref<1x64xf32, #tpu.memory_space<vmem>>, %arg4: memref<64x64xf32, #tpu.memory_space<vmem>>, %arg5: memref<1x64xf32, #tpu.memory_space<vmem>>, %arg6: memref<64x896xf32, #tpu.memory_space<vmem>>, %arg7: memref<1x896xf32, #tpu.memory_space<vmem>>, %arg8: memref<8x896xf32, #tpu.memory_space<vmem>>) attributes {dimension_semantics = [#tpu.dimension_semantics<parallel>], iteration_bounds = array<i64: 1>, scalar_prefetch = 0 : i64, scratch_operands = 0 : i64, tpu.core_type = #tpu.core_type<tc>, window_params = [{transform_indices = @transform_0, window_bounds = array<i64: 8, 20>}, {pipeline_mode = #tpu.pipeline_mode<synchronous>, transform_indices = @transform_1, window_bounds = array<i64: 20, 64>}, {pipeline_mode = #tpu.pipeline_mode<synchronous>, transform_indices = @transform_2, window_bounds = array<i64: 1, 64>}, {pipeline_mode = #tpu.pipeline_mode<synchronous>, transform_indices = @transform_3, window_bounds = array<i64: 64, 64>}, {pipeline_mode = #tpu.pipeline_mode<synchronous>, transform_indices = @transform_4, window_bounds = array<i64: 1, 64>}, {pipeline_mode = #tpu.pipeline_mode<synchronous>, transform_indices = @transform_5, window_bounds = array<i64: 64, 896>}, {pipeline_mode = #tpu.pipeline_mode<synchronous>, transform_indices = @transform_6, window_bounds = array<i64: 1, 896>}, {transform_indices = @transform_7, window_bounds = array<i64: 8, 896>}]} {
    %c0 = arith.constant 0 : index
    %c0_0 = arith.constant 0 : index
    %0 = vector.load %arg1[%c0, %c0_0] : memref<8x20xf32, #tpu.memory_space<vmem>>, vector<8x20xf32>
    %c0_1 = arith.constant 0 : index
    %c0_2 = arith.constant 0 : index
    %1 = vector.load %arg2[%c0_1, %c0_2] : memref<20x64xf32, #tpu.memory_space<vmem>>, vector<20x64xf32>
    %cst = arith.constant dense<0.000000e+00> : vector<8x64xf32>
    %2 = tpu.matmul %0, %1, %cst {dimension_numbers = #tpu.dot_dimension_numbers<[1], [0], [0], [1], [0, 0, 1, 1], [], []>} : vector<8x20xf32>, vector<20x64xf32>, vector<8x64xf32> -> vector<8x64xf32>
    %c0_3 = arith.constant 0 : index
    %c0_4 = arith.constant 0 : index
    %3 = vector.load %arg3[%c0_3, %c0_4] : memref<1x64xf32, #tpu.memory_space<vmem>>, vector<1x64xf32>
    %4 = vector.broadcast %3 : vector<1x64xf32> to vector<8x64xf32>
    %5 = arith.addf %2, %4 : vector<8x64xf32>
    %cst_5 = arith.constant 0.000000e+00 : f32
    %6 = vector.broadcast %cst_5 : f32 to vector<8x64xf32>
    %7 = arith.maximumf %5, %6 : vector<8x64xf32>
    %c0_6 = arith.constant 0 : index
    %c0_7 = arith.constant 0 : index
    %8 = vector.load %arg4[%c0_6, %c0_7] : memref<64x64xf32, #tpu.memory_space<vmem>>, vector<64x64xf32>
    %cst_8 = arith.constant dense<0.000000e+00> : vector<8x64xf32>
    %9 = tpu.matmul %7, %8, %cst_8 {dimension_numbers = #tpu.dot_dimension_numbers<[1], [0], [0], [1], [0, 0, 1, 1], [], []>} : vector<8x64xf32>, vector<64x64xf32>, vector<8x64xf32> -> vector<8x64xf32>
    %c0_9 = arith.constant 0 : index
    %c0_10 = arith.constant 0 : index
    %10 = vector.load %arg5[%c0_9, %c0_10] : memref<1x64xf32, #tpu.memory_space<vmem>>, vector<1x64xf32>
    %11 = vector.broadcast %10 : vector<1x64xf32> to vector<8x64xf32>
    %12 = arith.addf %9, %11 : vector<8x64xf32>
    %cst_11 = arith.constant 0.000000e+00 : f32
    %13 = vector.broadcast %cst_11 : f32 to vector<8x64xf32>
    %14 = arith.maximumf %12, %13 : vector<8x64xf32>
    %c0_12 = arith.constant 0 : index
    %c0_13 = arith.constant 0 : index
    %15 = vector.load %arg6[%c0_12, %c0_13] : memref<64x896xf32, #tpu.memory_space<vmem>>, vector<64x896xf32>
    %cst_14 = arith.constant dense<0.000000e+00> : vector<8x896xf32>
    %16 = tpu.matmul %14, %15, %cst_14 {dimension_numbers = #tpu.dot_dimension_numbers<[1], [0], [0], [1], [0, 0, 1, 1], [], []>} : vector<8x64xf32>, vector<64x896xf32>, vector<8x896xf32> -> vector<8x896xf32>
    %c0_15 = arith.constant 0 : index
    %c0_16 = arith.constant 0 : index
    %17 = vector.load %arg7[%c0_15, %c0_16] : memref<1x896xf32, #tpu.memory_space<vmem>>, vector<1x896xf32>
    %18 = vector.broadcast %17 : vector<1x896xf32> to vector<8x896xf32>
    %19 = arith.addf %16, %18 : vector<8x896xf32>
    %c0_17 = arith.constant 0 : index
    %c0_18 = arith.constant 0 : index
    %20 = vector.load %arg8[%c0_17, %c0_18] : memref<8x896xf32, #tpu.memory_space<vmem>>, vector<8x896xf32>
    tpu.vector_store %arg8[%c0_17, %c0_18], %19 {strides = array<i32>} : memref<8x896xf32, #tpu.memory_space<vmem>>, vector<8x896xf32>,
    return
  }
  func.func @transform_0(%arg0: i32) -> (i32, i32) {
    %c0_i32 = arith.constant 0 : i32
    %c0_i32_0 = arith.constant 0 : i32
    return %arg0, %c0_i32 : i32, i32
  }
  func.func @transform_1(%arg0: i32) -> (i32, i32) {
    %c0_i32 = arith.constant 0 : i32
    %c0_i32_0 = arith.constant 0 : i32
    %c0_i32_1 = arith.constant 0 : i32
    return %c0_i32, %c0_i32_0 : i32, i32
  }
  func.func @transform_2(%arg0: i32) -> (i32, i32) {
    %c0_i32 = arith.constant 0 : i32
    %c0_i32_0 = arith.constant 0 : i32
    %c0_i32_1 = arith.constant 0 : i32
    return %c0_i32, %c0_i32_0 : i32, i32
  }
  func.func @transform_3(%arg0: i32) -> (i32, i32) {
    %c0_i32 = arith.constant 0 : i32
    %c0_i32_0 = arith.constant 0 : i32
    %c0_i32_1 = arith.constant 0 : i32
    return %c0_i32, %c0_i32_0 : i32, i32
  }
  func.func @transform_4(%arg0: i32) -> (i32, i32) {
    %c0_i32 = arith.constant 0 : i32
    %c0_i32_0 = arith.constant 0 : i32
    %c0_i32_1 = arith.constant 0 : i32
    return %c0_i32, %c0_i32_0 : i32, i32
  }
  func.func @transform_5(%arg0: i32) -> (i32, i32) {
    %c0_i32 = arith.constant 0 : i32
    %c0_i32_0 = arith.constant 0 : i32
    %c0_i32_1 = arith.constant 0 : i32
    return %c0_i32, %c0_i32_0 : i32, i32
  }
  func.func @transform_6(%arg0: i32) -> (i32, i32) {
    %c0_i32 = arith.constant 0 : i32
    %c0_i32_0 = arith.constant 0 : i32
    %c0_i32_1 = arith.constant 0 : i32
    return %c0_i32, %c0_i32_0 : i32, i32
  }
  func.func @transform_7(%arg0: i32) -> (i32, i32) {
    %c0_i32 = arith.constant 0 : i32
    %c0_i32_0 = arith.constant 0 : i32
    return %arg0, %c0_i32 : i32, i32
  }
}

</mosaic_0001>

<bundles_post_ra>
// kernel: tpu_custom_call.1
= control target key start
LH: loop header
LB: loop body
LE: loop exit
PB: predicated region body
PF: predicated region fallthrough
CT: control target
= control target key end

     0   :  { %12 = vsyncpa [#allocation3], 0  ;;  %s1097_s0 = inlined_call_operand.hbm [shape: f32[8,20], index: 0, kind: input, shape index: {}]   ;;  %s1098_s1 = inlined_call_operand.hbm [shape: f32[20,64], index: 1, kind: input, shape index: {}]   ;;  %s1099_s2 = inlined_call_operand.vmem [shape: f32[1,64], index: 2, kind: input, shape index: {}]   ;;  %s1100_s3 = inlined_call_operand.hbm [shape: f32[64,64], index: 3, kind: input, shape index: {}]   ;;  %s1101_s4 = inlined_call_operand.vmem [shape: f32[1,64], index: 4, kind: input, shape index: {}]   ;;  %s1102_s5 = inlined_call_operand.hbm [shape: f32[64,896], index: 5, kind: input, shape index: {}]   ;;  %s1103_s6 = inlined_call_operand.vmem [shape: f32[1,896], index: 6, kind: input, shape index: {}]   ;;  %s1104_s7 = inlined_call_operand.hbm [shape: f32[8,896], index: 7, kind: output, shape index: {}]  }
   0x1   :  { %13 = vsyncpa [#allocation6], 0 }
   0x2   :  { %14 = vsyncpa [#allocation9], 0 }
   0x3   :  { %15 = vsyncpa [#allocation4], 0  ;;  %s946_s24 = smov [#allocation5]   ;;  %s828_s28 = scalar_lea.hbm %s1098_s1, 384 }
   0x4   :  { %s31_s25 = sshll.u32 %s946_s24, 4  ;;  %p829_p0 = scmp.ne.s32.totalorder %s1098_s1, %s828_s28  ;;  %s32_s25 = int_to_ptr.vmem [resolvable:$true] %s31_s25 }
   0x5   :  { %p832_p1 = scmp.lt.u32.totalorder %s828_s28, %s1098_s1 }
   0x7   :  { %p834_p2 = pnand %p832_p1, %p829_p0 }
   0x9   :  { %837 = shalt.err (!%p834_p2)
}
   0xa   :  { %s838_s10 = scalar_lea.vmem %s32_s25, 384  ;;  %p843_p4 = scmp.lt.s32.totalorder %s32_s25, %s32_s25 }
   0xb   :  { %p839_p3 = scmp.ne.s32.totalorder %s32_s25, %s838_s10  ;;  %p844_p5 = scmp.lt.s32.totalorder %s838_s10, %s838_s10 }
   0xd   :  { %p845_p6 = por %p844_p5, %p843_p4 }
   0xf   :  { %p846_p7 = pnand %p845_p6, %p839_p3 }
  0x11   :  { %849 = shalt.err (!%p846_p7)
}
  0x12   :  { %s947_s11 = smov 128   ;;  %s948_s12 = smov 8  }
  0x13   :  { %37 = dma.hbm_to_vmem [thread:$0]  %s1098_s1, 384, %s32_s25, [#allocation6], %s947_s11, %s947_s11, %s948_s12  }
  0x14   :  { %s949_s15 = smov [#allocation2]   ;;  %s950_s17 = smov [#allocation7]  }
  0x15   :  { %s22_s16 = sshll.u32 %s949_s15, 4  ;;  %s45_s18 = sshll.u32 %s950_s17, 4  ;;  %s23_s16 = int_to_ptr.vmem [resolvable:$true] %s22_s16  ;;  %s46_s18 = int_to_ptr.vmem [resolvable:$true] %s45_s18 }
  0x16   :  { %s850_s21 = scalar_lea.hbm %s1097_s0, 128 }
  0x17   :  { %p851_p8 = scmp.ne.s32.totalorder %s1097_s0, %s850_s21  ;;  %p854_p9 = scmp.lt.u32.totalorder %s850_s21, %s1097_s0 }
  0x19   :  { %p856_p10 = pnand %p854_p9, %p851_p8 }
  0x1b   :  { %859 = shalt.err (!%p856_p10)
}
  0x1c   :  { %s860_s1 = scalar_lea.vmem %s23_s16, 128  ;;  %p865_p12 = scmp.lt.s32.totalorder %s23_s16, %s23_s16 }
  0x1d   :  { %p861_p11 = scmp.ne.s32.totalorder %s23_s16, %s860_s1  ;;  %p866_p13 = scmp.lt.s32.totalorder %s860_s1, %s860_s1 }
  0x1f   :  { %p867_p0 = por %p866_p13, %p865_p12 }
  0x21   :  { %p868_p1 = pnand %p867_p0, %p861_p11 }
  0x23   :  { %871 = shalt.err (!%p868_p1)
}
  0x24   :  { %25 = dma.hbm_to_vmem [thread:$0]  %s1097_s0, 128, %s23_s16, [#allocation3]  }
  0x25   :  { %s872_s30 = scalar_lea.hbm %s1100_s3, 1024 }
  0x26   :  { %p873_p2 = scmp.ne.s32.totalorder %s1100_s3, %s872_s30  ;;  %p876_p3 = scmp.lt.u32.totalorder %s872_s30, %s1100_s3 }
  0x28   :  { %p878_p4 = pnand %p876_p3, %p873_p2 }
  0x2a   :  { %881 = shalt.err (!%p878_p4)
}
  0x2b   :  { %s882_s14 = scalar_lea.vmem %s46_s18, 1024  ;;  %p887_p6 = scmp.lt.s32.totalorder %s46_s18, %s46_s18 }
  0x2c   :  { %p883_p5 = scmp.ne.s32.totalorder %s46_s18, %s882_s14  ;;  %p888_p7 = scmp.lt.s32.totalorder %s882_s14, %s882_s14 }
  0x2e   :  { %p889_p8 = por %p888_p7, %p887_p6 }
  0x30   :  { %p890_p9 = pnand %p889_p8, %p883_p5 }
  0x32   :  { %893 = shalt.err (!%p890_p9)
}
  0x33   :  { %51 = dma.hbm_to_vmem [thread:$0]  %s1100_s3, 1024, %s46_s18, [#allocation6], %s947_s11, %s947_s11, %s948_s12  }
  0x34   :  { %s951_s16 = smov [#allocation8]   ;;  %s894_s21 = scalar_lea.hbm %s1102_s5, 7168 }
  0x35   :  { %s59_s17 = sshll.u32 %s951_s16, 4  ;;  %p895_p10 = scmp.ne.s32.totalorder %s1102_s5, %s894_s21  ;;  %s60_s17 = int_to_ptr.vmem [resolvable:$true] %s59_s17 }
  0x36   :  { %p898_p11 = scmp.lt.u32.totalorder %s894_s21, %s1102_s5 }
  0x38   :  { %p900_p12 = pnand %p898_p11, %p895_p10 }
  0x3a   :  { %903 = shalt.err (!%p900_p12)
}
  0x3b   :  { %s904_s1 = scalar_lea.vmem %s60_s17, 7168  ;;  %p909_p0 = scmp.lt.s32.totalorder %s60_s17, %s60_s17 }
  0x3c   :  { %p905_p13 = scmp.ne.s32.totalorder %s60_s17, %s904_s1  ;;  %p910_p1 = scmp.lt.s32.totalorder %s904_s1, %s904_s1 }
  0x3e   :  { %p911_p2 = por %p910_p1, %p909_p0 }
  0x40   :  { %p912_p3 = pnand %p911_p2, %p905_p13 }
  0x42   :  { %915 = shalt.err (!%p912_p3)
}
  0x43   :  { %s952_s3 = smov 896   ;;  %s953_s11 = smov 56  }
  0x44   :  { %65 = dma.hbm_to_vmem [thread:$0]  %s1102_s5, 7168, %s60_s17, [#allocation9], %s952_s3, %s952_s3, %s953_s11  }
  0x45   :  { %938 = dma.done.wait [#allocation3], 128  }
  0x46   :  { %939 = vsyncadd [#allocation3], 4294967168 }
  0x47   :  { %940 = dma.done.wait [#allocation6], 1408  }
  0x48   :  { %941 = vsyncadd [#allocation6], 4294965888 }
  0x49   :  { %942 = dma.done.wait [#allocation9], 7168  }
  0x4a   :  { %943 = vsyncadd [#allocation9], 4294960128  ;;  %v954_v0 = vmov 0.0|0.0   ;;  %vm955_vm0 = vmmov 0   ;;  %v956_v1 = vmov 0.0   ;;  %v81_v2 = vld [vmem:[#allocation5] sm:$0xff] }
  0x4b   :  { %741 = vmatprep.subr.bf16.mxu0 %v954_v0  ;;  %700 = vmatprep.mubr.msk.f32.mxu0 %vm955_vm0, %v956_v1  ;;  %v82_v3 = vld [vmem:[#allocation5 + $0x8] sm:$0xff]  ;;  %v170_v5 = vld [vmem:[#allocation7] sm:$0xff]  ;;  %v171_v6 = vld [vmem:[#allocation7 + $0x8] sm:$0xff]  ;;  %vm95_vm1 = vcmask 1043456   ;;  %vm91_vm2 = vcmask 162816   ;;  %vm185_vm3 = vcmask 523264  }
  0x4c   :  { %744 = vmatprep.subr.bf16.mxu1 %v954_v0  ;;  %719 = vmatprep.mubr.msk.f32.mxu1 %vm955_vm0, %v956_v1  ;;  %v742_v4 = vpack.c.bf16 %v82_v3, %v81_v2  ;;  %v745_v7 = vpack.c.bf16 %v171_v6, %v170_v5  ;;  %v172_v8 = vld [vmem:[#allocation7 + $0x10] sm:$0xff]  ;;  %v173_v9 = vld [vmem:[#allocation7 + $0x18] sm:$0xff]  ;;  %v80_v12 = vld [vmem:[#allocation2] sm:$0xff] }
  0x4d   :  { %v83_v10 = vld [vmem:[#allocation5 + $0x10] sm:$0xf]  ;;  %v748_v11 = vpack.c.bf16 %v173_v9, %v172_v8  ;;  %v174_v13 = vld [vmem:[#allocation7 + $0x20] sm:$0xff]  ;;  %v175_v14 = vld [vmem:[#allocation7 + $0x28] sm:$0xff] }
  0x4e   :  { %743 = vmatpush3.bf16.msra.mxu0 %v742_v4  ;;  %746 = vmatpush3.bf16.msra.mxu1 %v745_v7  ;;  %v751_v15 = vpack.c.bf16 %v175_v14, %v174_v13  ;;  %v176_v16 = vld [vmem:[#allocation7 + $0x30] sm:$0xff]  ;;  %v177_v17 = vld [vmem:[#allocation7 + $0x38] sm:$0xff]  ;;  %v261_v19 = vld [vmem:[#allocation8 + $0x8] sm:$0xff] }
  0x4f   :  { %698 = vmatprep.subr.mxu0 %v956_v1  ;;  %747 = vmatprep.subr.bf16.mxu1 %v954_v0  ;;  %v754_v18 = vpack.c.bf16 %v177_v17, %v176_v16  ;;  %v268_v20 = vld [vmem:[#allocation8 + $0x40] sm:$0xff]  ;;  %v263_v21 = vld [vmem:[#allocation8 + $0x18] sm:$0xff]  ;;  %v270_v23 = vld [vmem:[#allocation8 + $0x50] sm:$0xff] }
  0x50   :  { %v756_v22 = vpack.c.bf16 %v268_v20, %v261_v19  ;;  %v260_v24 = vld [vmem:[#allocation8] sm:$0xff]  ;;  %v267_v25 = vld [vmem:[#allocation8 + $0x38] sm:$0xff]  ;;  %v772_v26 = vpack.c.bf16 %v270_v23, %v263_v21  ;;  %v282_v29 = vld [vmem:[#allocation8 + $0xb0] sm:$0xff] }
  0x51   :  { %v758_v27 = vpack.c.bf16 %v267_v25, %v260_v24  ;;  %v275_v28 = vld [vmem:[#allocation8 + $0x78] sm:$0xff]  ;;  %v274_v31 = vld [vmem:[#allocation8 + $0x70] sm:$0xff]  ;;  %v281_v32 = vld [vmem:[#allocation8 + $0xa8] sm:$0xff] }
  0x52   :  { %699 = vmatpush3.msk.msra.mxu0 %vm95_vm1, %v83_v10  ;;  %749 = vmatpush3.bf16.msra.mxu1 %v748_v11  ;;  %v760_v30 = vpack.c.bf16 %v282_v29, %v275_v28  ;;  %v762_v33 = vpack.c.bf16 %v281_v32, %v274_v31  ;;  %v289_v34 = vld [vmem:[#allocation8 + $0xe8] sm:$0xff]  ;;  %v296_v35 = vld [vmem:[#allocation8 + $0x120] sm:$0xff]  ;;  %v295_v38 = vld [vmem:[#allocation8 + $0x118] sm:$0xff] }
  0x53   :  { %701 = vmatmul.mubr.msk.f32.vlgmr.msra.gmra.mrb[0].mxu0 %vm91_vm2, %v80_v12  ;;  %750 = vmatprep.subr.bf16.mxu1 %v954_v0  ;;  %v764_v36 = vpack.c.bf16 %v296_v35, %v289_v34  ;;  %v288_v37 = vld [vmem:[#allocation8 + $0xe0] sm:$0xff]  ;;  %v262_v41 = vld [vmem:[#allocation8 + $0x10] sm:$0xff]  ;;  %v269_v42 = vld [vmem:[#allocation8 + $0x48] sm:$0xff] }
  0x54   :  { %420 = vmatprep.mubr.f32.mxu0 %v956_v1  ;;  %757 = vmatprep.subr.bf16.mxu0 %v756_v22  ;;  %v766_v39 = vpack.c.bf16 %v295_v38, %v288_v37  ;;  %v663_v40 = vld [vmem:[%s1099_s2] ss:$0 sm:$0xff]  ;;  %v277_v44 = vld [vmem:[#allocation8 + $0x88] sm:$0xff]  ;;  %v774_v48 = vpack.c.bf16 %v269_v42, %v262_v41  ;;  %v283_v52 = vld [vmem:[#allocation8 + $0xb8] sm:$0xff] }
  0x55   :  { %759 = vmatpush1.bf16.msra.mxu0 %v758_v27  ;;  %v284_v45 = vld [vmem:[#allocation8 + $0xc0] sm:$0xff]  ;;  %v291_v53 = vld [vmem:[#allocation8 + $0xf8] sm:$0xff]  ;;  %v298_v54 = vld [vmem:[#allocation8 + $0x130] sm:$0xff] }
  0x56   :  { %752 = vmatpush3.bf16.msra.mxu1 %v751_v15  ;;  %761 = vmatprep.subr.bf16.mxu0 %v760_v30  ;;  %v776_v50 = vpack.c.bf16 %v284_v45, %v277_v44  ;;  %v276_v51 = vld [vmem:[#allocation8 + $0x80] sm:$0xff]  ;;  %v780_v56 = vpack.c.bf16 %v298_v54, %v291_v53  ;;  %v290_v57 = vld [vmem:[#allocation8 + $0xf0] sm:$0xff]  ;;  %v297_v58 = vld [vmem:[#allocation8 + $0x128] sm:$0xff] }
  0x57   :  { %753 = vmatprep.subr.bf16.mxu1 %v954_v0  ;;  %v778_v55 = vpack.c.bf16 %v283_v52, %v276_v51  ;;  %v782_v59 = vpack.c.bf16 %v297_v58, %v290_v57  ;;  %v303_v60 = vld [vmem:[#allocation8 + $0x158] sm:$0xff]  ;;  %v310_v61 = vld [vmem:[#allocation8 + $0x190] sm:$0xff]  ;;  %v305_v62 = vld [vmem:[#allocation8 + $0x168] sm:$0xff] }
  0x58   :  { %v768_v63 = vpack.c.bf16 %v310_v61, %v303_v60  ;;  %v312_v2 = vld [vmem:[#allocation8 + $0x1a0] sm:$0xff]  ;;  %v302_v3 = vld [vmem:[#allocation8 + $0x150] sm:$0xff]  ;;  %v309_v4 = vld [vmem:[#allocation8 + $0x188] sm:$0xff] }
  0x59   :  { %763 = vmatpush1.bf16.msra.mxu0 %v762_v33  ;;  %v784_v5 = vpack.c.bf16 %v312_v2, %v305_v62  ;;  %v770_v6 = vpack.c.bf16 %v309_v4, %v302_v3  ;;  %v304_v7 = vld [vmem:[#allocation8 + $0x160] sm:$0xff]  ;;  %v311_v8 = vld [vmem:[#allocation8 + $0x198] sm:$0xff]  ;;  %v265_v10 = vld [vmem:[#allocation8 + $0x28] sm:$0xff] }
  0x5a   :  { %755 = vmatpush3.bf16.msra.mxu1 %v754_v18  ;;  %765 = vmatprep.subr.bf16.mxu0 %v764_v36  ;;  %v786_v9 = vpack.c.bf16 %v311_v8, %v304_v7  ;;  %v272_v11 = vld [vmem:[#allocation8 + $0x60] sm:$0xff]  ;;  %v271_v15 = vld [vmem:[#allocation8 + $0x58] sm:$0xff]  ;;  %v266_v16 = vld [vmem:[#allocation8 + $0x30] sm:$0xff] }
  0x5b   :  { %773 = vmatprep.subr.bf16.mxu1 %v772_v26  ;;  %v788_v12 = vpack.c.bf16 %v272_v11, %v265_v10  ;;  %v666_v13 = vld [vmem:[%s1101_s4] ss:$0 sm:$0xff]  ;;  %v273_v17 = vld [vmem:[#allocation8 + $0x68] sm:$0xff]  ;;  %v279_v19 = vld [vmem:[#allocation8 + $0x98] sm:$0xff] }
  0x5c   :  { %v264_v14 = vld [vmem:[#allocation8 + $0x20] sm:$0xff]  ;;  %v286_v20 = vld [vmem:[#allocation8 + $0xd0] sm:$0xff]  ;;  %v805_v24 = vpack.c.bf16 %v273_v17, %v266_v16  ;;  %v285_v28 = vld [vmem:[#allocation8 + $0xc8] sm:$0xff] }
  0x5d   :  { %767 = vmatpush1.bf16.msra.mxu0 %v766_v39  ;;  %v790_v23 = vpack.c.bf16 %v271_v15, %v264_v14  ;;  %v278_v25 = vld [vmem:[#allocation8 + $0x90] sm:$0xff]  ;;  %v792_v27 = vpack.c.bf16 %v286_v20, %v279_v19  ;;  %v280_v29 = vld [vmem:[#allocation8 + $0xa0] sm:$0xff]  ;;  %v287_v30 = vld [vmem:[#allocation8 + $0xd8] sm:$0xff] }
  0x5e   :  { %769 = vmatprep.subr.bf16.mxu0 %v768_v63  ;;  %v293_v31 = vld [vmem:[#allocation8 + $0x108] sm:$0xff]  ;;  %v300_v32 = vld [vmem:[#allocation8 + $0x140] sm:$0xff]  ;;  %v794_v33 = vpack.c.bf16 %v285_v28, %v278_v25  ;;  %v808_v34 = vpack.c.bf16 %v287_v30, %v280_v29  ;;  %v299_v37 = vld [vmem:[#allocation8 + $0x138] sm:$0xff] }
  0x5f   :  { %v292_v35 = vld [vmem:[#allocation8 + $0x100] sm:$0xff]  ;;  %v796_v36 = vpack.c.bf16 %v300_v32, %v293_v31  ;;  %v294_v38 = vld [vmem:[#allocation8 + $0x110] sm:$0xff]  ;;  %v301_v39 = vld [vmem:[#allocation8 + $0x148] sm:$0xff] }
  0x60   :  { %v314_v41 = vld [vmem:[#allocation8 + $0x1b0] sm:$0xff]  ;;  %v798_v42 = vpack.c.bf16 %v299_v37, %v292_v35  ;;  %v316_v54 = vld [vmem:[%s1103_s6] sm:$0xff]  ;;  %s957_s6 = smov [#allocation10]  }
  0x61   :  { %771 = vmatpush1.bf16.msra.mxu0 %v770_v6  ;;  %v306_v44 = vld [vmem:[#allocation8 + $0x170] sm:$0xff]  ;;  %s652_s29 = sshll.u32 %s957_s6, 4  ;;  %s653_s29 = int_to_ptr.vmem [resolvable:$true] %s652_s29 }
  0x62   :  { %789 = vmatprep.subr.bf16.mxu0 %v788_v12  ;;  %s916_s30 = scalar_lea.vmem %s653_s29, 896  ;;  %p921_p5 = scmp.lt.s32.totalorder %s653_s29, %s653_s29 }
  0x63   :  { %p917_p4 = scmp.ne.s32.totalorder %s653_s29, %s916_s30  ;;  %p922_p6 = scmp.lt.s32.totalorder %s916_s30, %s916_s30 }
  0x65   :  { %p923_p7 = por %p922_p6, %p921_p5 }
  0x67   :  { %p924_p8 = pnand %p923_p7, %p917_p4 }
 0x126   :  { %v165_v43 = vpop.f32.mrb[0].mxu0 }
 0x127   :  { %v166_v46 = vadd.f32 %v663_v40, %v165_v43  ;;  %v702_v47 = vpop.f32.mrb[1].mxu0  ;;  %v307_v40 = vld [vmem:[#allocation8 + $0x178] sm:$0xff]  ;;  %v811_v43 = vpack.c.bf16 %v301_v39, %v294_v38 }
 0x128   :  { %v800_v45 = vpack.c.bf16 %v314_v41, %v307_v40  ;;  %v308_v47 = vld [vmem:[#allocation8 + $0x180] sm:$0xff] }
 0x129   :  { %v169_v49 = vmax.f32 %v166_v46, 0.0  ;;  %v313_v46 = vld [vmem:[#allocation8 + $0x1a8] sm:$0xff] }
 0x12b   :  { %720 = vmatmul.mubr.msk.f32.vlgmr.msra.gmra.mrb[0].mxu1 %vm185_vm3, %v169_v49  ;;  %v802_v49 = vpack.c.bf16 %v313_v46, %v306_v44 }
 0x12c   :  { %775 = vmatpush1.bf16.msra.mxu1 %v774_v48  ;;  %491 = vmatprep.mubr.f32.mxu1 %v956_v1  ;;  %v315_v48 = vld [vmem:[#allocation8 + $0x1b8] sm:$0xff] }
 0x12d   :  { %777 = vmatprep.subr.bf16.mxu1 %v776_v50  ;;  %v814_v50 = vpack.c.bf16 %v315_v48, %v308_v47 }
 0x130   :  { %779 = vmatpush1.bf16.msra.mxu1 %v778_v55 }
 0x131   :  { %781 = vmatprep.subr.bf16.mxu1 %v780_v56 }
 0x134   :  { %783 = vmatpush1.bf16.msra.mxu1 %v782_v59 }
 0x135   :  { %785 = vmatprep.subr.bf16.mxu1 %v784_v5 }
 0x138   :  { %787 = vmatpush1.bf16.msra.mxu1 %v786_v9 }
 0x139   :  { %804 = vmatprep.subr.bf16.mxu1 %v954_v0 }
 0x1fe   :  { %v255_v18 = vpop.f32.mrb[0].mxu1 }
 0x1ff   :  { %v256_v21 = vadd.f32 %v666_v13, %v255_v18  ;;  %v721_v22 = vpop.f32.mrb[1].mxu1 }
 0x201   :  { %v259_v26 = vmax.f32 %v256_v21, 0.0 }
 0x203   :  { %668 = vmatmul.mubr.msk.f32.vlgmr.msra.gmra.mrb[2].mxu0 %vm185_vm3, %v259_v26  ;;  %669 = vmatmul.mubr.msk.f32.vlgmr.msra.gmra.mrb[2].mxu1 %vm185_vm3, %v259_v26 }
 0x204   :  { %791 = vmatpush1.bf16.msra.mxu0 %v790_v23  ;;  %806 = vmatpush3.bf16.msra.mxu1 %v805_v24 }
 0x205   :  { %793 = vmatprep.subr.bf16.mxu0 %v792_v27  ;;  %807 = vmatprep.subr.bf16.mxu1 %v954_v0 }
 0x206   :  { %562 = vmatprep.mubr.f32.mxu0 %v956_v1  ;;  %738 = vmatprep.mubr.msk.f32.mxu1 %vm955_vm0, %v956_v1  ;;  %v318_v1 = vlaneseq }
 0x208   :  { %795 = vmatpush1.bf16.msra.mxu0 %v794_v33  ;;  %809 = vmatpush3.bf16.msra.mxu1 %v808_v34  ;;  %v319_v51 = vshrl.u32 %v318_v1, 7 }
 0x209   :  { %797 = vmatprep.subr.bf16.mxu0 %v796_v36  ;;  %810 = vmatprep.subr.bf16.mxu1 %v954_v0 }
 0x20a   :  { %v320_v52 = vsub.s32 0, %v319_v51  ;;  %v328_v53 = vsub.s32 2, %v319_v51  ;;  %v324_v55 = vsub.s32 1, %v319_v51  ;;  %v332_v56 = vsub.s32 3, %v319_v51 }
 0x20b   :  { %v336_v6 = vsub.s32 4, %v319_v51  ;;  %v344_v7 = vsub.s32 6, %v319_v51  ;;  %v340_v8 = vsub.s32 5, %v319_v51 }
 0x20c   :  { %799 = vmatpush1.bf16.msra.mxu0 %v798_v42  ;;  %812 = vmatpush3.bf16.msra.mxu1 %v811_v43  ;;  %v321_v57 = vrot.slane %v316_v54, %v320_v52  ;;  %v329_v58 = vrot.slane %v316_v54, %v328_v53  ;;  %v325_v59 = vrot.slane %v316_v54, %v324_v55 }
 0x20d   :  { %801 = vmatprep.subr.bf16.mxu0 %v800_v45  ;;  %813 = vmatprep.subr.bf16.mxu1 %v954_v0  ;;  %v333_v0 = vrot.slane %v316_v54, %v332_v56  ;;  %v337_v9 = vrot.slane %v316_v54, %v336_v6  ;;  %v345_v10 = vrot.slane %v316_v54, %v344_v7 }
 0x20e   :  { %v341_v11 = vrot.slane %v316_v54, %v340_v8 }
 0x210   :  { %803 = vmatpush1.bf16.msra.mxu0 %v802_v49  ;;  %815 = vmatpush3.bf16.msra.mxu1 %v814_v50 }
 0x213   :  { %670 = vmatmul.mubr.msk.f32.vlgmr.msra.gmra.mrb[4].mxu0 %vm185_vm3, %v259_v26  ;;  %739 = vmatmul.mubr.msk.f32.vlgmr.msra.gmra.mrb[4].mxu1 %vm185_vm3, %v259_v26 }
 0x2d6   :  { %v422_v60 = vpop.f32.mrb[2].mxu0  ;;  %v493_v61 = vpop.f32.mrb[2].mxu1 }
 0x2d7   :  { %v423_v62 = vadd.f32 %v422_v60, %v321_v57  ;;  %v494_v63 = vadd.f32 %v493_v61, %v329_v58  ;;  %v424_v2 = vpop.f32.mrb[3].mxu0  ;;  %v495_v3 = vpop.f32.mrb[3].mxu1 }
 0x2d8   :  { %v425_v4 = vadd.f32 %v424_v2, %v325_v59  ;;  %v496_v5 = vadd.f32 %v495_v3, %v333_v0 }
 0x2d9   :  { %639 = vst [vmem:[#allocation10] sm:$0xff] %v423_v62  ;;  %641 = vst [vmem:[#allocation10 + $0x10] sm:$0xff] %v494_v63 }
 0x2da   :  { %640 = vst [vmem:[#allocation10 + $0x8] sm:$0xff] %v425_v4  ;;  %642 = vst [vmem:[#allocation10 + $0x18] sm:$0xff] %v496_v5 }
 0x2e6   :  { %v564_v12 = vpop.f32.mrb[4].mxu0  ;;  %v635_v13 = vpop.f32.mrb[4].mxu1 }
 0x2e7   :  { %v565_v14 = vadd.f32 %v564_v12, %v337_v9  ;;  %v636_v15 = vadd.f32 %v635_v13, %v345_v10  ;;  %v566_v16 = vpop.f32.mrb[5].mxu0  ;;  %v740_v17 = vpop.f32.mrb[5].mxu1 }
 0x2e8   :  { %v567_v18 = vadd.f32 %v566_v16, %v341_v11 }
 0x2e9   :  { %643 = vst [vmem:[#allocation10 + $0x20] sm:$0xff] %v565_v14  ;;  %645 = vst [vmem:[#allocation10 + $0x30] sm:$0xff] %v636_v15 }
 0x2ea   :  { %644 = vst [vmem:[#allocation10 + $0x28] sm:$0xff] %v567_v18 }
 0x2eb   :  { %927 = shalt.err (!%p924_p8)
}
 0x2ec   :  { %s928_s10 = scalar_lea.hbm %s1104_s7, 896 }
 0x2ed   :  { %p929_p9 = scmp.ne.s32.totalorder %s1104_s7, %s928_s10  ;;  %p932_p10 = scmp.lt.u32.totalorder %s928_s10, %s1104_s7 }
 0x2ef   :  { %p934_p11 = pnand %p932_p10, %p929_p9 }
 0x2f1   :  { %937 = shalt.err (!%p934_p11)
}
 0x2f2   :  { %655 = dma.vmem_to_hbm [thread:$0]  %s653_s29, 896, %s1104_s7, [#allocation4]  }
 0x2f3   :  { %944 = dma.done.wait [#allocation4], 896  }
 0x2f4   :  { %945 = vsyncadd [#allocation4], 4294966400 }
 0x2f5   :  { %659 = vsyncpa [#allocation3], 1 }
 0x2f6   :  { %660 = vsyncpa [#allocation6], 1 }
 0x2f7   :  { %661 = vsyncpa [#allocation9], 1 }
 0x2f8   :  { %662 = vsyncpa [#allocation4], 1 }

// kernel: tpu_custom_call.1
= control target key start
LH: loop header
LB: loop body
LE: loop exit
PB: predicated region body
PF: predicated region fallthrough
CT: control target
= control target key end

     0   :  { %12 = vsyncpa [#allocation3], 0  ;;  %s1097_s0 = inlined_call_operand.hbm [shape: f32[8,20], index: 0, kind: input, shape index: {}]   ;;  %s1098_s1 = inlined_call_operand.hbm [shape: f32[20,64], index: 1, kind: input, shape index: {}]   ;;  %s1099_s2 = inlined_call_operand.vmem [shape: f32[1,64], index: 2, kind: input, shape index: {}]   ;;  %s1100_s3 = inlined_call_operand.hbm [shape: f32[64,64], index: 3, kind: input, shape index: {}]   ;;  %s1101_s4 = inlined_call_operand.vmem [shape: f32[1,64], index: 4, kind: input, shape index: {}]   ;;  %s1102_s5 = inlined_call_operand.hbm [shape: f32[64,896], index: 5, kind: input, shape index: {}]   ;;  %s1103_s6 = inlined_call_operand.vmem [shape: f32[1,896], index: 6, kind: input, shape index: {}]   ;;  %s1104_s7 = inlined_call_operand.hbm [shape: f32[8,896], index: 7, kind: output, shape index: {}]  }
   0x1   :  { %13 = vsyncpa [#allocation6], 0 }
   0x2   :  { %14 = vsyncpa [#allocation9], 0 }
   0x3   :  { %15 = vsyncpa [#allocation4], 0  ;;  %s946_s24 = smov [#allocation5]   ;;  %s828_s28 = scalar_lea.hbm %s1098_s1, 384 }
   0x4   :  { %s31_s25 = sshll.u32 %s946_s24, 4  ;;  %p829_p0 = scmp.ne.s32.totalorder %s1098_s1, %s828_s28  ;;  %s32_s25 = int_to_ptr.vmem [resolvable:$true] %s31_s25 }
   0x5   :  { %p832_p1 = scmp.lt.u32.totalorder %s828_s28, %s1098_s1 }
   0x7   :  { %p834_p2 = pnand %p832_p1, %p829_p0 }
   0x9   :  { %837 = shalt.err (!%p834_p2)
}
   0xa   :  { %s838_s10 = scalar_lea.vmem %s32_s25, 384  ;;  %p843_p4 = scmp.lt.s32.totalorder %s32_s25, %s32_s25 }
   0xb   :  { %p839_p3 = scmp.ne.s32.totalorder %s32_s25, %s838_s10  ;;  %p844_p5 = scmp.lt.s32.totalorder %s838_s10, %s838_s10 }
   0xd   :  { %p845_p6 = por %p844_p5, %p843_p4 }
   0xf   :  { %p846_p7 = pnand %p845_p6, %p839_p3 }
  0x11   :  { %849 = shalt.err (!%p846_p7)
}
  0x12   :  { %s947_s11 = smov 128   ;;  %s948_s12 = smov 8  }
  0x13   :  { %37 = dma.hbm_to_vmem [thread:$0]  %s1098_s1, 384, %s32_s25, [#allocation6], %s947_s11, %s947_s11, %s948_s12  }
  0x14   :  { %s949_s15 = smov [#allocation2]   ;;  %s950_s17 = smov [#allocation7]  }
  0x15   :  { %s22_s16 = sshll.u32 %s949_s15, 4  ;;  %s45_s18 = sshll.u32 %s950_s17, 4  ;;  %s23_s16 = int_to_ptr.vmem [resolvable:$true] %s22_s16  ;;  %s46_s18 = int_to_ptr.vmem [resolvable:$true] %s45_s18 }
  0x16   :  { %s850_s21 = scalar_lea.hbm %s1097_s0, 128 }
  0x17   :  { %p851_p8 = scmp.ne.s32.totalorder %s1097_s0, %s850_s21  ;;  %p854_p9 = scmp.lt.u32.totalorder %s850_s21, %s1097_s0 }
  0x19   :  { %p856_p10 = pnand %p854_p9, %p851_p8 }
  0x1b   :  { %859 = shalt.err (!%p856_p10)
}
  0x1c   :  { %s860_s1 = scalar_lea.vmem %s23_s16, 128  ;;  %p865_p12 = scmp.lt.s32.totalorder %s23_s16, %s23_s16 }
  0x1d   :  { %p861_p11 = scmp.ne.s32.totalorder %s23_s16, %s860_s1  ;;  %p866_p13 = scmp.lt.s32.totalorder %s860_s1, %s860_s1 }
  0x1f   :  { %p867_p0 = por %p866_p13, %p865_p12 }
  0x21   :  { %p868_p1 = pnand %p867_p0, %p861_p11 }
  0x23   :  { %871 = shalt.err (!%p868_p1)
}
  0x24   :  { %25 = dma.hbm_to_vmem [thread:$0]  %s1097_s0, 128, %s23_s16, [#allocation3]  }
  0x25   :  { %s872_s30 = scalar_lea.hbm %s1100_s3, 1024 }
  0x26   :  { %p873_p2 = scmp.ne.s32.totalorder %s1100_s3, %s872_s30  ;;  %p876_p3 = scmp.lt.u32.totalorder %s872_s30, %s1100_s3 }
  0x28   :  { %p878_p4 = pnand %p876_p3, %p873_p2 }
  0x2a   :  { %881 = shalt.err (!%p878_p4)
}
  0x2b   :  { %s882_s14 = scalar_lea.vmem %s46_s18, 1024  ;;  %p887_p6 = scmp.lt.s32.totalorder %s46_s18, %s46_s18 }
  0x2c   :  { %p883_p5 = scmp.ne.s32.totalorder %s46_s18, %s882_s14  ;;  %p888_p7 = scmp.lt.s32.totalorder %s882_s14, %s882_s14 }
  0x2e   :  { %p889_p8 = por %p888_p7, %p887_p6 }
  0x30   :  { %p890_p9 = pnand %p889_p8, %p883_p5 }
  0x32   :  { %893 = shalt.err (!%p890_p9)
}
  0x33   :  { %51 = dma.hbm_to_vmem [thread:$0]  %s1100_s3, 1024, %s46_s18, [#allocation6], %s947_s11, %s947_s11, %s948_s12  }
  0x34   :  { %s951_s16 = smov [#allocation8]   ;;  %s894_s21 = scalar_lea.hbm %s1102_s5, 7168 }
  0x35   :  { %s59_s17 = sshll.u32 %s951_s16, 4  ;;  %p895_p10 = scmp.ne.s32.totalorder %s1102_s5, %s894_s21  ;;  %s60_s17 = int_to_ptr.vmem [resolvable:$true] %s59_s17 }
  0x36   :  { %p898_p11 = scmp.lt.u32.totalorder %s894_s21, %s1102_s5 }
  0x38   :  { %p900_p12 = pnand %p898_p11, %p895_p10 }
  0x3a   :  { %903 = shalt.err (!%p900_p12)
}
  0x3b   :  { %s904_s1 = scalar_lea.vmem %s60_s17, 7168  ;;  %p909_p0 = scmp.lt.s32.totalorder %s60_s17, %s60_s17 }
  0x3c   :  { %p905_p13 = scmp.ne.s32.totalorder %s60_s17, %s904_s1  ;;  %p910_p1 = scmp.lt.s32.totalorder %s904_s1, %s904_s1 }
  0x3e   :  { %p911_p2 = por %p910_p1, %p909_p0 }
  0x40   :  { %p912_p3 = pnand %p911_p2, %p905_p13 }
  0x42   :  { %915 = shalt.err (!%p912_p3)
}
  0x43   :  { %s952_s3 = smov 896   ;;  %s953_s11 = smov 56  }
  0x44   :  { %65 = dma.hbm_to_vmem [thread:$0]  %s1102_s5, 7168, %s60_s17, [#allocation9], %s952_s3, %s952_s3, %s953_s11  }
  0x45   :  { %938 = dma.done.wait [#allocation3], 128  }
  0x46   :  { %939 = vsyncadd [#allocation3], 4294967168 }
  0x47   :  { %940 = dma.done.wait [#allocation6], 1408  }
  0x48   :  { %941 = vsyncadd [#allocation6], 4294965888 }
  0x49   :  { %942 = dma.done.wait [#allocation9], 7168  }
  0x4a   :  { %943 = vsyncadd [#allocation9], 4294960128  ;;  %v954_v0 = vmov 0.0|0.0   ;;  %vm955_vm0 = vmmov 0   ;;  %v956_v1 = vmov 0.0   ;;  %v81_v2 = vld [vmem:[#allocation5] sm:$0xff] }
  0x4b   :  { %741 = vmatprep.subr.bf16.mxu0 %v954_v0  ;;  %700 = vmatprep.mubr.msk.f32.mxu0 %vm955_vm0, %v956_v1  ;;  %v82_v3 = vld [vmem:[#allocation5 + $0x8] sm:$0xff]  ;;  %v170_v5 = vld [vmem:[#allocation7] sm:$0xff]  ;;  %v171_v6 = vld [vmem:[#allocation7 + $0x8] sm:$0xff]  ;;  %vm95_vm1 = vcmask 1043456   ;;  %vm91_vm2 = vcmask 162816   ;;  %vm185_vm3 = vcmask 523264  }
  0x4c   :  { %744 = vmatprep.subr.bf16.mxu1 %v954_v0  ;;  %719 = vmatprep.mubr.msk.f32.mxu1 %vm955_vm0, %v956_v1  ;;  %v742_v4 = vpack.c.bf16 %v82_v3, %v81_v2  ;;  %v745_v7 = vpack.c.bf16 %v171_v6, %v170_v5  ;;  %v172_v8 = vld [vmem:[#allocation7 + $0x10] sm:$0xff]  ;;  %v173_v9 = vld [vmem:[#allocation7 + $0x18] sm:$0xff]  ;;  %v80_v12 = vld [vmem:[#allocation2] sm:$0xff] }
  0x4d   :  { %v83_v10 = vld [vmem:[#allocation5 + $0x10] sm:$0xf]  ;;  %v748_v11 = vpack.c.bf16 %v173_v9, %v172_v8  ;;  %v174_v13 = vld [vmem:[#allocation7 + $0x20] sm:$0xff]  ;;  %v175_v14 = vld [vmem:[#allocation7 + $0x28] sm:$0xff] }
  0x4e   :  { %743 = vmatpush3.bf16.msra.mxu0 %v742_v4  ;;  %746 = vmatpush3.bf16.msra.mxu1 %v745_v7  ;;  %v751_v15 = vpack.c.bf16 %v175_v14, %v174_v13  ;;  %v176_v16 = vld [vmem:[#allocation7 + $0x30] sm:$0xff]  ;;  %v177_v17 = vld [vmem:[#allocation7 + $0x38] sm:$0xff]  ;;  %v261_v19 = vld [vmem:[#allocation8 + $0x8] sm:$0xff] }
  0x4f   :  { %698 = vmatprep.subr.mxu0 %v956_v1  ;;  %747 = vmatprep.subr.bf16.mxu1 %v954_v0  ;;  %v754_v18 = vpack.c.bf16 %v177_v17, %v176_v16  ;;  %v268_v20 = vld [vmem:[#allocation8 + $0x40] sm:$0xff]  ;;  %v263_v21 = vld [vmem:[#allocation8 + $0x18] sm:$0xff]  ;;  %v270_v23 = vld [vmem:[#allocation8 + $0x50] sm:$0xff] }
  0x50   :  { %v756_v22 = vpack.c.bf16 %v268_v20, %v261_v19  ;;  %v260_v24 = vld [vmem:[#allocation8] sm:$0xff]  ;;  %v267_v25 = vld [vmem:[#allocation8 + $0x38] sm:$0xff]  ;;  %v772_v26 = vpack.c.bf16 %v270_v23, %v263_v21  ;;  %v282_v29 = vld [vmem:[#allocation8 + $0xb0] sm:$0xff] }
  0x51   :  { %v758_v27 = vpack.c.bf16 %v267_v25, %v260_v24  ;;  %v275_v28 = vld [vmem:[#allocation8 + $0x78] sm:$0xff]  ;;  %v274_v31 = vld [vmem:[#allocation8 + $0x70] sm:$0xff]  ;;  %v281_v32 = vld [vmem:[#allocation8 + $0xa8] sm:$0xff] }
  0x52   :  { %699 = vmatpush3.msk.msra.mxu0 %vm95_vm1, %v83_v10  ;;  %749 = vmatpush3.bf16.msra.mxu1 %v748_v11  ;;  %v760_v30 = vpack.c.bf16 %v282_v29, %v275_v28  ;;  %v762_v33 = vpack.c.bf16 %v281_v32, %v274_v31  ;;  %v289_v34 = vld [vmem:[#allocation8 + $0xe8] sm:$0xff]  ;;  %v296_v35 = vld [vmem:[#allocation8 + $0x120] sm:$0xff]  ;;  %v295_v38 = vld [vmem:[#allocation8 + $0x118] sm:$0xff] }
  0x53   :  { %701 = vmatmul.mubr.msk.f32.vlgmr.msra.gmra.mrb[0].mxu0 %vm91_vm2, %v80_v12  ;;  %750 = vmatprep.subr.bf16.mxu1 %v954_v0  ;;  %v764_v36 = vpack.c.bf16 %v296_v35, %v289_v34  ;;  %v288_v37 = vld [vmem:[#allocation8 + $0xe0] sm:$0xff]  ;;  %v262_v41 = vld [vmem:[#allocation8 + $0x10] sm:$0xff]  ;;  %v269_v42 = vld [vmem:[#allocation8 + $0x48] sm:$0xff] }
  0x54   :  { %420 = vmatprep.mubr.f32.mxu0 %v956_v1  ;;  %757 = vmatprep.subr.bf16.mxu0 %v756_v22  ;;  %v766_v39 = vpack.c.bf16 %v295_v38, %v288_v37  ;;  %v663_v40 = vld [vmem:[%s1099_s2] ss:$0 sm:$0xff]  ;;  %v277_v44 = vld [vmem:[#allocation8 + $0x88] sm:$0xff]  ;;  %v774_v48 = vpack.c.bf16 %v269_v42, %v262_v41  ;;  %v283_v52 = vld [vmem:[#allocation8 + $0xb8] sm:$0xff] }
  0x55   :  { %759 = vmatpush1.bf16.msra.mxu0 %v758_v27  ;;  %v284_v45 = vld [vmem:[#allocation8 + $0xc0] sm:$0xff]  ;;  %v291_v53 = vld [vmem:[#allocation8 + $0xf8] sm:$0xff]  ;;  %v298_v54 = vld [vmem:[#allocation8 + $0x130] sm:$0xff] }
  0x56   :  { %752 = vmatpush3.bf16.msra.mxu1 %v751_v15  ;;  %761 = vmatprep.subr.bf16.mxu0 %v760_v30  ;;  %v776_v50 = vpack.c.bf16 %v284_v45, %v277_v44  ;;  %v276_v51 = vld [vmem:[#allocation8 + $0x80] sm:$0xff]  ;;  %v780_v56 = vpack.c.bf16 %v298_v54, %v291_v53  ;;  %v290_v57 = vld [vmem:[#allocation8 + $0xf0] sm:$0xff]  ;;  %v297_v58 = vld [vmem:[#allocation8 + $0x128] sm:$0xff] }
  0x57   :  { %753 = vmatprep.subr.bf16.mxu1 %v954_v0  ;;  %v778_v55 = vpack.c.bf16 %v283_v52, %v276_v51  ;;  %v782_v59 = vpack.c.bf16 %v297_v58, %v290_v57  ;;  %v303_v60 = vld [vmem:[#allocation8 + $0x158] sm:$0xff]  ;;  %v310_v61 = vld [vmem:[#allocation8 + $0x190] sm:$0xff]  ;;  %v305_v62 = vld [vmem:[#allocation8 + $0x168] sm:$0xff] }
  0x58   :  { %v768_v63 = vpack.c.bf16 %v310_v61, %v303_v60  ;;  %v312_v2 = vld [vmem:[#allocation8 + $0x1a0] sm:$0xff]  ;;  %v302_v3 = vld [vmem:[#allocation8 + $0x150] sm:$0xff]  ;;  %v309_v4 = vld [vmem:[#allocation8 + $0x188] sm:$0xff] }
  0x59   :  { %763 = vmatpush1.bf16.msra.mxu0 %v762_v33  ;;  %v784_v5 = vpack.c.bf16 %v312_v2, %v305_v62  ;;  %v770_v6 = vpack.c.bf16 %v309_v4, %v302_v3  ;;  %v304_v7 = vld [vmem:[#allocation8 + $0x160] sm:$0xff]  ;;  %v311_v8 = vld [vmem:[#allocation8 + $0x198] sm:$0xff]  ;;  %v265_v10 = vld [vmem:[#allocation8 + $0x28] sm:$0xff] }
  0x5a   :  { %755 = vmatpush3.bf16.msra.mxu1 %v754_v18  ;;  %765 = vmatprep.subr.bf16.mxu0 %v764_v36  ;;  %v786_v9 = vpack.c.bf16 %v311_v8, %v304_v7  ;;  %v272_v11 = vld [vmem:[#allocation8 + $0x60] sm:$0xff]  ;;  %v271_v15 = vld [vmem:[#allocation8 + $0x58] sm:$0xff]  ;;  %v266_v16 = vld [vmem:[#allocation8 + $0x30] sm:$0xff] }
  0x5b   :  { %773 = vmatprep.subr.bf16.mxu1 %v772_v26  ;;  %v788_v12 = vpack.c.bf16 %v272_v11, %v265_v10  ;;  %v666_v13 = vld [vmem:[%s1101_s4] ss:$0 sm:$0xff]  ;;  %v273_v17 = vld [vmem:[#allocation8 + $0x68] sm:$0xff]  ;;  %v279_v19 = vld [vmem:[#allocation8 + $0x98] sm:$0xff] }
  0x5c   :  { %v264_v14 = vld [vmem:[#allocation8 + $0x20] sm:$0xff]  ;;  %v286_v20 = vld [vmem:[#allocation8 + $0xd0] sm:$0xff]  ;;  %v805_v24 = vpack.c.bf16 %v273_v17, %v266_v16  ;;  %v285_v28 = vld [vmem:[#allocation8 + $0xc8] sm:$0xff] }
  0x5d   :  { %767 = vmatpush1.bf16.msra.mxu0 %v766_v39  ;;  %v790_v23 = vpack.c.bf16 %v271_v15, %v264_v14  ;;  %v278_v25 = vld [vmem:[#allocation8 + $0x90] sm:$0xff]  ;;  %v792_v27 = vpack.c.bf16 %v286_v20, %v279_v19  ;;  %v280_v29 = vld [vmem:[#allocation8 + $0xa0] sm:$0xff]  ;;  %v287_v30 = vld [vmem:[#allocation8 + $0xd8] sm:$0xff] }
  0x5e   :  { %769 = vmatprep.subr.bf16.mxu0 %v768_v63  ;;  %v293_v31 = vld [vmem:[#allocation8 + $0x108] sm:$0xff]  ;;  %v300_v32 = vld [vmem:[#allocation8 + $0x140] sm:$0xff]  ;;  %v794_v33 = vpack.c.bf16 %v285_v28, %v278_v25  ;;  %v808_v34 = vpack.c.bf16 %v287_v30, %v280_v29  ;;  %v299_v37 = vld [vmem:[#allocation8 + $0x138] sm:$0xff] }
  0x5f   :  { %v292_v35 = vld [vmem:[#allocation8 + $0x100] sm:$0xff]  ;;  %v796_v36 = vpack.c.bf16 %v300_v32, %v293_v31  ;;  %v294_v38 = vld [vmem:[#allocation8 + $0x110] sm:$0xff]  ;;  %v301_v39 = vld [vmem:[#allocation8 + $0x148] sm:$0xff] }
  0x60   :  { %v314_v41 = vld [vmem:[#allocation8 + $0x1b0] sm:$0xff]  ;;  %v798_v42 = vpack.c.bf16 %v299_v37, %v292_v35  ;;  %v316_v54 = vld [vmem:[%s1103_s6] sm:$0xff]  ;;  %s957_s6 = smov [#allocation10]  }
  0x61   :  { %771 = vmatpush1.bf16.msra.mxu0 %v770_v6  ;;  %v306_v44 = vld [vmem:[#allocation8 + $0x170] sm:$0xff]  ;;  %s652_s29 = sshll.u32 %s957_s6, 4  ;;  %s653_s29 = int_to_ptr.vmem [resolvable:$true] %s652_s29 }
  0x62   :  { %789 = vmatprep.subr.bf16.mxu0 %v788_v12  ;;  %s916_s30 = scalar_lea.vmem %s653_s29, 896  ;;  %p921_p5 = scmp.lt.s32.totalorder %s653_s29, %s653_s29 }
  0x63   :  { %p917_p4 = scmp.ne.s32.totalorder %s653_s29, %s916_s30  ;;  %p922_p6 = scmp.lt.s32.totalorder %s916_s30, %s916_s30 }
  0x65   :  { %p923_p7 = por %p922_p6, %p921_p5 }
  0x67   :  { %p924_p8 = pnand %p923_p7, %p917_p4 }
 0x126   :  { %v165_v43 = vpop.f32.mrb[0].mxu0 }
 0x127   :  { %v166_v46 = vadd.f32 %v663_v40, %v165_v43  ;;  %v702_v47 = vpop.f32.mrb[1].mxu0  ;;  %v307_v40 = vld [vmem:[#allocation8 + $0x178] sm:$0xff]  ;;  %v811_v43 = vpack.c.bf16 %v301_v39, %v294_v38 }
 0x128   :  { %v800_v45 = vpack.c.bf16 %v314_v41, %v307_v40  ;;  %v308_v47 = vld [vmem:[#allocation8 + $0x180] sm:$0xff] }
 0x129   :  { %v169_v49 = vmax.f32 %v166_v46, 0.0  ;;  %v313_v46 = vld [vmem:[#allocation8 + $0x1a8] sm:$0xff] }
 0x12b   :  { %720 = vmatmul.mubr.msk.f32.vlgmr.msra.gmra.mrb[0].mxu1 %vm185_vm3, %v169_v49  ;;  %v802_v49 = vpack.c.bf16 %v313_v46, %v306_v44 }
 0x12c   :  { %775 = vmatpush1.bf16.msra.mxu1 %v774_v48  ;;  %491 = vmatprep.mubr.f32.mxu1 %v956_v1  ;;  %v315_v48 = vld [vmem:[#allocation8 + $0x1b8] sm:$0xff] }
 0x12d   :  { %777 = vmatprep.subr.bf16.mxu1 %v776_v50  ;;  %v814_v50 = vpack.c.bf16 %v315_v48, %v308_v47 }
 0x130   :  { %779 = vmatpush1.bf16.msra.mxu1 %v778_v55 }
 0x131   :  { %781 = vmatprep.subr.bf16.mxu1 %v780_v56 }
 0x134   :  { %783 = vmatpush1.bf16.msra.mxu1 %v782_v59 }
 0x135   :  { %785 = vmatprep.subr.bf16.mxu1 %v784_v5 }
 0x138   :  { %787 = vmatpush1.bf16.msra.mxu1 %v786_v9 }
 0x139   :  { %804 = vmatprep.subr.bf16.mxu1 %v954_v0 }
 0x1fe   :  { %v255_v18 = vpop.f32.mrb[0].mxu1 }
 0x1ff   :  { %v256_v21 = vadd.f32 %v666_v13, %v255_v18  ;;  %v721_v22 = vpop.f32.mrb[1].mxu1 }
 0x201   :  { %v259_v26 = vmax.f32 %v256_v21, 0.0 }
 0x203   :  { %668 = vmatmul.mubr.msk.f32.vlgmr.msra.gmra.mrb[2].mxu0 %vm185_vm3, %v259_v26  ;;  %669 = vmatmul.mubr.msk.f32.vlgmr.msra.gmra.mrb[2].mxu1 %vm185_vm3, %v259_v26 }
 0x204   :  { %791 = vmatpush1.bf16.msra.mxu0 %v790_v23  ;;  %806 = vmatpush3.bf16.msra.mxu1 %v805_v24 }
 0x205   :  { %793 = vmatprep.subr.bf16.mxu0 %v792_v27  ;;  %807 = vmatprep.subr.bf16.mxu1 %v954_v0 }
 0x206   :  { %562 = vmatprep.mubr.f32.mxu0 %v956_v1  ;;  %738 = vmatprep.mubr.msk.f32.mxu1 %vm955_vm0, %v956_v1  ;;  %v318_v1 = vlaneseq }
 0x208   :  { %795 = vmatpush1.bf16.msra.mxu0 %v794_v33  ;;  %809 = vmatpush3.bf16.msra.mxu1 %v808_v34  ;;  %v319_v51 = vshrl.u32 %v318_v1, 7 }
 0x209   :  { %797 = vmatprep.subr.bf16.mxu0 %v796_v36  ;;  %810 = vmatprep.subr.bf16.mxu1 %v954_v0 }
 0x20a   :  { %v320_v52 = vsub.s32 0, %v319_v51  ;;  %v328_v53 = vsub.s32 2, %v319_v51  ;;  %v324_v55 = vsub.s32 1, %v319_v51  ;;  %v332_v56 = vsub.s32 3, %v319_v51 }
 0x20b   :  { %v336_v6 = vsub.s32 4, %v319_v51  ;;  %v344_v7 = vsub.s32 6, %v319_v51  ;;  %v340_v8 = vsub.s32 5, %v319_v51 }
 0x20c   :  { %799 = vmatpush1.bf16.msra.mxu0 %v798_v42  ;;  %812 = vmatpush3.bf16.msra.mxu1 %v811_v43  ;;  %v321_v57 = vrot.slane %v316_v54, %v320_v52  ;;  %v329_v58 = vrot.slane %v316_v54, %v328_v53  ;;  %v325_v59 = vrot.slane %v316_v54, %v324_v55 }
 0x20d   :  { %801 = vmatprep.subr.bf16.mxu0 %v800_v45  ;;  %813 = vmatprep.subr.bf16.mxu1 %v954_v0  ;;  %v333_v0 = vrot.slane %v316_v54, %v332_v56  ;;  %v337_v9 = vrot.slane %v316_v54, %v336_v6  ;;  %v345_v10 = vrot.slane %v316_v54, %v344_v7 }
 0x20e   :  { %v341_v11 = vrot.slane %v316_v54, %v340_v8 }
 0x210   :  { %803 = vmatpush1.bf16.msra.mxu0 %v802_v49  ;;  %815 = vmatpush3.bf16.msra.mxu1 %v814_v50 }
 0x213   :  { %670 = vmatmul.mubr.msk.f32.vlgmr.msra.gmra.mrb[4].mxu0 %vm185_vm3, %v259_v26  ;;  %739 = vmatmul.mubr.msk.f32.vlgmr.msra.gmra.mrb[4].mxu1 %vm185_vm3, %v259_v26 }
 0x2d6   :  { %v422_v60 = vpop.f32.mrb[2].mxu0  ;;  %v493_v61 = vpop.f32.mrb[2].mxu1 }
 0x2d7   :  { %v423_v62 = vadd.f32 %v422_v60, %v321_v57  ;;  %v494_v63 = vadd.f32 %v493_v61, %v329_v58  ;;  %v424_v2 = vpop.f32.mrb[3].mxu0  ;;  %v495_v3 = vpop.f32.mrb[3].mxu1 }
 0x2d8   :  { %v425_v4 = vadd.f32 %v424_v2, %v325_v59  ;;  %v496_v5 = vadd.f32 %v495_v3, %v333_v0 }
 0x2d9   :  { %639 = vst [vmem:[#allocation10] sm:$0xff] %v423_v62  ;;  %641 = vst [vmem:[#allocation10 + $0x10] sm:$0xff] %v494_v63 }
 0x2da   :  { %640 = vst [vmem:[#allocation10 + $0x8] sm:$0xff] %v425_v4  ;;  %642 = vst [vmem:[#allocation10 + $0x18] sm:$0xff] %v496_v5 }
 0x2e6   :  { %v564_v12 = vpop.f32.mrb[4].mxu0  ;;  %v635_v13 = vpop.f32.mrb[4].mxu1 }
 0x2e7   :  { %v565_v14 = vadd.f32 %v564_v12, %v337_v9  ;;  %v636_v15 = vadd.f32 %v635_v13, %v345_v10  ;;  %v566_v16 = vpop.f32.mrb[5].mxu0  ;;  %v740_v17 = vpop.f32.mrb[5].mxu1 }
 0x2e8   :  { %v567_v18 = vadd.f32 %v566_v16, %v341_v11 }
 0x2e9   :  { %643 = vst [vmem:[#allocation10 + $0x20] sm:$0xff] %v565_v14  ;;  %645 = vst [vmem:[#allocation10 + $0x30] sm:$0xff] %v636_v15 }
 0x2ea   :  { %644 = vst [vmem:[#allocation10 + $0x28] sm:$0xff] %v567_v18 }
 0x2eb   :  { %927 = shalt.err (!%p924_p8)
}
 0x2ec   :  { %s928_s10 = scalar_lea.hbm %s1104_s7, 896 }
 0x2ed   :  { %p929_p9 = scmp.ne.s32.totalorder %s1104_s7, %s928_s10  ;;  %p932_p10 = scmp.lt.u32.totalorder %s928_s10, %s1104_s7 }
 0x2ef   :  { %p934_p11 = pnand %p932_p10, %p929_p9 }
 0x2f1   :  { %937 = shalt.err (!%p934_p11)
}
 0x2f2   :  { %655 = dma.vmem_to_hbm [thread:$0]  %s653_s29, 896, %s1104_s7, [#allocation4]  }
 0x2f3   :  { %944 = dma.done.wait [#allocation4], 896  }
 0x2f4   :  { %945 = vsyncadd [#allocation4], 4294966400 }
 0x2f5   :  { %659 = vsyncpa [#allocation3], 1 }
 0x2f6   :  { %660 = vsyncpa [#allocation6], 1 }
 0x2f7   :  { %661 = vsyncpa [#allocation9], 1 }
 0x2f8   :  { %662 = vsyncpa [#allocation4], 1 }

</bundles_post_ra>
